<compile_context>
chip_gen: v7x
topology: tpu7x:2x2x1
jax: 0.10.0
libtpu: 0.0.40
codegen_flags: <defaults>
</compile_context>

<pallas_src>
import jax
import jax.numpy as jnp
from jax import lax
from jax.experimental import pallas as pl
from jax.experimental.pallas import tpu as pltpu


def _round_up(x: int, m: int) -> int:
    return ((x + m - 1) // m) * m


def _pick_batch_tile(B: int, max_tb: int = 256) -> int:
    """Batch tile: multiple of 8, capped, and split into >=2 tiles when possible so the
    'parallel' grid axis can be sharded across both TensorCores on v7x."""
    B8 = _round_up(B, 8)
    if B8 >= 16:
        tb = min(max_tb, _round_up((B8 + 1) // 2, 8))
    else:
        tb = B8
    return tb


def fasttext_kernel(ids_ref, emb_ref, w_ref, b_ref, out_ref, acc_ref):
    # ids_ref: SMEM int32 [B_pad, S]   scalar-prefetched token ids (batch-major)
    # emb_ref: VMEM f32   [V_pad, E]   full embedding table, resident across the grid
    # w_ref  : VMEM f32   [E, O_pad]   fc weight pre-scaled by 1/S (resident)
    # b_ref  : VMEM f32   [1, O_pad]   fc bias (resident)
    # out_ref: VMEM f32   [TB, O_pad]  output tile for this batch tile
    # acc_ref: VMEM f32   [TB, E]      per-row sum-pool accumulator (fully overwritten)
    i = pl.program_id(0)
    TB, E = acc_ref.shape
    S = ids_ref.shape[1]

    def pool_row(bi, carry):
        row = i * TB + bi

        def add_token(s, acc_row):
            tok = ids_ref[row, s]                     # scalar id from SMEM
            return acc_row + emb_ref[pl.ds(tok, 1), :]  # gather one table row from VMEM

        acc_row = lax.fori_loop(
            0, S, add_token,
            jnp.zeros((1, E), jnp.float32),
            unroll=min(8, S),
        )
        acc_ref[pl.ds(bi, 1), :] = acc_row            # write sum directly (no zero+add pass)
        return carry

    lax.fori_loop(0, TB, pool_row, 0)

    # Mean scale is folded into w; single MXU matmul per batch tile, lane-dense output store.
    out_ref[...] = (
        jnp.dot(acc_ref[...], w_ref[...], preferred_element_type=jnp.float32)
        + b_ref[...]
    ).astype(out_ref.dtype)


def fasttext_forward(text, emb_table, fc_w, fc_b):
    """text: int32 [seq_len, batch]; returns f32 [batch, output_dim]."""
    S, B = text.shape
    V, E = emb_table.shape
    O = fc_w.shape[1]

    TB = _pick_batch_tile(B)
    B_pad = _round_up(B, TB)
    O_pad = _round_up(max(O, 1), 128)   # lane-dense (unmasked) output stores
    V_pad = _round_up(V, 8)             # clean sublane layout for the resident table

    # Token ids, batch-major, int32, padded batch rows index row 0 (results sliced off).
    ids = text.T.astype(jnp.int32)
    if B_pad > B:
        ids = jnp.pad(ids, ((0, B_pad - B), (0, 0)))

    emb = emb_table.astype(jnp.float32)
    if V_pad > V:
        emb = jnp.pad(emb, ((0, V_pad - V), (0, 0)))

    # Fold the 1/seq_len mean scale into the weight; pad weight/bias to O_pad lanes.
    w_scaled = fc_w.astype(jnp.float32) / jnp.float32(S)
    w_pad = jnp.zeros((E, O_pad), jnp.float32).at[:, :O].set(w_scaled)
    b_pad = jnp.zeros((1, O_pad), jnp.float32).at[:, :O].set(
        fc_b.astype(jnp.float32).reshape(1, O))

    grid = (B_pad // TB,)

    # Honest VMEM accounting: resident table + (double-buffered) weight/bias + out tile + acc.
    vmem_bytes = (
        V_pad * E * 4            # embedding table (resident)
        + 2 * E * O_pad * 4      # fc weight
        + 2 * 1 * O_pad * 4      # fc bias
        + 2 * TB * O_pad * 4     # output tile (double-buffered)
        + TB * E * 4             # accumulator scratch
    )
    vmem_limit = int(min(max(2 * vmem_bytes, 16 * 1024 * 1024), 32 * 1024 * 1024))

    # Fused traffic: ids + table + weights + output (no [B,S,E] intermediate).
    cost = pl.CostEstimate(
        flops=2 * B_pad * E * O_pad + B_pad * S * E,
        transcendentals=0,
        bytes_accessed=B_pad * S * 4 + V_pad * E * 4 + E * O_pad * 4 + B_pad * O_pad * 4,
    )

    out_padded = pl.pallas_call(
        fasttext_kernel,
        out_shape=jax.ShapeDtypeStruct((B_pad, O_pad), jnp.float32),
        grid_spec=pltpu.PrefetchScalarGridSpec(
            num_scalar_prefetch=1,            # ids -> SMEM, passed to index_maps + kernel
            grid=grid,
            in_specs=[
                pl.BlockSpec((V_pad, E), lambda i, ids: (0, 0)),   # emb table (resident)
                pl.BlockSpec((E, O_pad), lambda i, ids: (0, 0)),   # fc weight (resident)
                pl.BlockSpec((1, O_pad), lambda i, ids: (0, 0)),   # fc bias   (resident)
            ],
            out_specs=pl.BlockSpec((TB, O_pad), lambda i, ids: (i, 0)),
            scratch_shapes=[pltpu.VMEM((TB, E), jnp.float32)],
        ),
        compiler_params=pltpu.CompilerParams(
            dimension_semantics=("parallel",),
            vmem_limit_bytes=vmem_limit,
        ),
        cost_estimate=cost,
    )(ids, emb, w_pad, b_pad)

    return out_padded[:B, :O]


if __name__ == "__main__":
    # Small, deterministic configuration consistent with the module's __init__.
    vocab_size = 100
    embedding_dim = 32
    output_dim = 8
    pad_idx = 1
    seq_len = 8
    batch = 2

    key = jax.random.PRNGKey(0)
    k_emb, k_w, k_b, k_txt = jax.random.split(key, 4)

    # nn.Embedding(vocab, emb, padding_idx=pad_idx): N(0,1) init, padding row zeroed.
    emb_table = jax.random.normal(k_emb, (vocab_size, embedding_dim), dtype=jnp.float32)
    emb_table = emb_table.at[pad_idx].set(0.0)

    # nn.Linear(emb, out): store weight as [emb_dim, output_dim].
    bound = 1.0 / (embedding_dim ** 0.5)
    fc_w = jax.random.uniform(k_w, (embedding_dim, output_dim),
                              minval=-bound, maxval=bound, dtype=jnp.float32)
    fc_b = jax.random.uniform(k_b, (output_dim,),
                              minval=-bound, maxval=bound, dtype=jnp.float32)

    # text: [seq_len, batch] integer token ids.
    text = jax.random.randint(k_txt, (seq_len, batch), 0, vocab_size, dtype=jnp.int32)

    out = fasttext_forward(text, emb_table, fc_w, fc_b)
    out = jax.block_until_ready(out)

    # Pure-JAX reference check of the forward semantics (embed -> permute -> mean -> fc).
    ref = jnp.take(emb_table, text.T, axis=0).mean(axis=1) @ fc_w + fc_b
    assert out.shape == (batch, output_dim)
    assert jnp.allclose(out, ref, atol=1e-5, rtol=1e-5)

    print("KERNEL_OK")
</pallas_src>

<mosaic_0001>
module attributes {stable_mosaic.version = 11 : i64} {
  func.func @fasttext_kernel(%arg0: i32, %arg1: memref<8x8xi32, #tpu.memory_space<smem>>, %arg2: memref<104x32xf32, #tpu.memory_space<vmem>>, %arg3: memref<32x128xf32, #tpu.memory_space<vmem>>, %arg4: memref<1x128xf32, #tpu.memory_space<vmem>>, %arg5: memref<8x128xf32, #tpu.memory_space<vmem>>, %arg6: memref<8x32xf32, #tpu.memory_space<vmem>>) attributes {dimension_semantics = [#tpu.dimension_semantics<parallel>], iteration_bounds = array<i64: 1>, scalar_prefetch = 1 : i64, scratch_operands = 1 : i64, tpu.core_type = #tpu.core_type<tc>, window_params = [{pipeline_mode = #tpu.pipeline_mode<synchronous>, transform_indices = @transform_0, window_bounds = array<i64: 104, 32>}, {pipeline_mode = #tpu.pipeline_mode<synchronous>, transform_indices = @transform_1, window_bounds = array<i64: 32, 128>}, {pipeline_mode = #tpu.pipeline_mode<synchronous>, transform_indices = @transform_2, window_bounds = array<i64: 1, 128>}, {transform_indices = @transform_3, window_bounds = array<i64: 8, 128>}]} {
    %c0_i32 = arith.constant 0 : i32
    %c8_i32 = arith.constant 8 : i32
    %0 = arith.addi %c0_i32, %c8_i32 : i32
    %c1_i32 = arith.constant 1 : i32
    scf.for %arg7 = %c0_i32 to %0 step %c1_i32  : i32 {
      %c8_i32_8 = arith.constant 8 : i32
      %8 = arith.muli %arg0, %c8_i32_8 : i32
      %9 = arith.addi %8, %arg7 : i32
      %cst_9 = arith.constant 0.000000e+00 : f32
      %10 = vector.broadcast %cst_9 : f32 to vector<1x32xf32>
      %c0_i32_10 = arith.constant 0 : i32
      %11 = arith.index_cast %9 : i32 to index
      %12 = arith.index_cast %c0_i32_10 : i32 to index
      %13 = memref.load %arg1[%11, %12] : memref<8x8xi32, #tpu.memory_space<smem>>
      %14 = arith.index_cast %13 : i32 to index
      %c0_11 = arith.constant 0 : index
      %15 = vector.load %arg2[%14, %c0_11] : memref<104x32xf32, #tpu.memory_space<vmem>>, vector<1x32xf32>
      %16 = arith.addf %10, %15 : vector<1x32xf32>
      %c1_i32_12 = arith.constant 1 : i32
      %17 = arith.index_cast %9 : i32 to index
      %18 = arith.index_cast %c1_i32_12 : i32 to index
      %19 = memref.load %arg1[%17, %18] : memref<8x8xi32, #tpu.memory_space<smem>>
      %20 = arith.index_cast %19 : i32 to index
      %c0_13 = arith.constant 0 : index
      %21 = vector.load %arg2[%20, %c0_13] : memref<104x32xf32, #tpu.memory_space<vmem>>, vector<1x32xf32>
      %22 = arith.addf %16, %21 : vector<1x32xf32>
      %c2_i32 = arith.constant 2 : i32
      %23 = arith.index_cast %9 : i32 to index
      %24 = arith.index_cast %c2_i32 : i32 to index
      %25 = memref.load %arg1[%23, %24] : memref<8x8xi32, #tpu.memory_space<smem>>
      %26 = arith.index_cast %25 : i32 to index
      %c0_14 = arith.constant 0 : index
      %27 = vector.load %arg2[%26, %c0_14] : memref<104x32xf32, #tpu.memory_space<vmem>>, vector<1x32xf32>
      %28 = arith.addf %22, %27 : vector<1x32xf32>
      %c3_i32 = arith.constant 3 : i32
      %29 = arith.index_cast %9 : i32 to index
      %30 = arith.index_cast %c3_i32 : i32 to index
      %31 = memref.load %arg1[%29, %30] : memref<8x8xi32, #tpu.memory_space<smem>>
      %32 = arith.index_cast %31 : i32 to index
      %c0_15 = arith.constant 0 : index
      %33 = vector.load %arg2[%32, %c0_15] : memref<104x32xf32, #tpu.memory_space<vmem>>, vector<1x32xf32>
      %34 = arith.addf %28, %33 : vector<1x32xf32>
      %c4_i32 = arith.constant 4 : i32
      %35 = arith.index_cast %9 : i32 to index
      %36 = arith.index_cast %c4_i32 : i32 to index
      %37 = memref.load %arg1[%35, %36] : memref<8x8xi32, #tpu.memory_space<smem>>
      %38 = arith.index_cast %37 : i32 to index
      %c0_16 = arith.constant 0 : index
      %39 = vector.load %arg2[%38, %c0_16] : memref<104x32xf32, #tpu.memory_space<vmem>>, vector<1x32xf32>
      %40 = arith.addf %34, %39 : vector<1x32xf32>
      %c5_i32 = arith.constant 5 : i32
      %41 = arith.index_cast %9 : i32 to index
      %42 = arith.index_cast %c5_i32 : i32 to index
      %43 = memref.load %arg1[%41, %42] : memref<8x8xi32, #tpu.memory_space<smem>>
      %44 = arith.index_cast %43 : i32 to index
      %c0_17 = arith.constant 0 : index
      %45 = vector.load %arg2[%44, %c0_17] : memref<104x32xf32, #tpu.memory_space<vmem>>, vector<1x32xf32>
      %46 = arith.addf %40, %45 : vector<1x32xf32>
      %c6_i32 = arith.constant 6 : i32
      %47 = arith.index_cast %9 : i32 to index
      %48 = arith.index_cast %c6_i32 : i32 to index
      %49 = memref.load %arg1[%47, %48] : memref<8x8xi32, #tpu.memory_space<smem>>
      %50 = arith.index_cast %49 : i32 to index
      %c0_18 = arith.constant 0 : index
      %51 = vector.load %arg2[%50, %c0_18] : memref<104x32xf32, #tpu.memory_space<vmem>>, vector<1x32xf32>
      %52 = arith.addf %46, %51 : vector<1x32xf32>
      %c7_i32 = arith.constant 7 : i32
      %53 = arith.index_cast %9 : i32 to index
      %54 = arith.index_cast %c7_i32 : i32 to index
      %55 = memref.load %arg1[%53, %54] : memref<8x8xi32, #tpu.memory_space<smem>>
      %56 = arith.index_cast %55 : i32 to index
      %c0_19 = arith.constant 0 : index
      %57 = vector.load %arg2[%56, %c0_19] : memref<104x32xf32, #tpu.memory_space<vmem>>, vector<1x32xf32>
      %58 = arith.addf %52, %57 : vector<1x32xf32>
      %c8_i32_20 = arith.constant 8 : i32
      %59 = arith.index_cast %arg7 : i32 to index
      %c0_21 = arith.constant 0 : index
      %60 = vector.load %arg6[%59, %c0_21] : memref<8x32xf32, #tpu.memory_space<vmem>>, vector<1x32xf32>
      tpu.vector_store %arg6[%59, %c0_21], %58 {strides = array<i32>} : memref<8x32xf32, #tpu.memory_space<vmem>>, vector<1x32xf32>,
    }
    %c8_i32_0 = arith.constant 8 : i32
    %c0 = arith.constant 0 : index
    %c0_1 = arith.constant 0 : index
    %1 = vector.load %arg6[%c0, %c0_1] : memref<8x32xf32, #tpu.memory_space<vmem>>, vector<8x32xf32>
    %c0_2 = arith.constant 0 : index
    %c0_3 = arith.constant 0 : index
    %2 = vector.load %arg3[%c0_2, %c0_3] : memref<32x128xf32, #tpu.memory_space<vmem>>, vector<32x128xf32>
    %cst = arith.constant dense<0.000000e+00> : vector<8x128xf32>
    %3 = tpu.matmul %1, %2, %cst {dimension_numbers = #tpu.dot_dimension_numbers<[1], [0], [0], [1], [0, 0, 1, 1], [], []>} : vector<8x32xf32>, vector<32x128xf32>, vector<8x128xf32> -> vector<8x128xf32>
    %c0_4 = arith.constant 0 : index
    %c0_5 = arith.constant 0 : index
    %4 = vector.load %arg4[%c0_4, %c0_5] : memref<1x128xf32, #tpu.memory_space<vmem>>, vector<1x128xf32>
    %5 = vector.broadcast %4 : vector<1x128xf32> to vector<8x128xf32>
    %6 = arith.addf %3, %5 : vector<8x128xf32>
    %c0_6 = arith.constant 0 : index
    %c0_7 = arith.constant 0 : index
    %7 = vector.load %arg5[%c0_6, %c0_7] : memref<8x128xf32, #tpu.memory_space<vmem>>, vector<8x128xf32>
    tpu.vector_store %arg5[%c0_6, %c0_7], %6 {strides = array<i32>} : memref<8x128xf32, #tpu.memory_space<vmem>>, vector<8x128xf32>,
    return
  }
  func.func @transform_0(%arg0: i32, %arg1: memref<8x8xi32, #tpu.memory_space<smem>>) -> (i32, i32) {
    %c0_i32 = arith.constant 0 : i32
    %c0_i32_0 = arith.constant 0 : i32
    %c0_i32_1 = arith.constant 0 : i32
    return %c0_i32, %c0_i32_0 : i32, i32
  }
  func.func @transform_1(%arg0: i32, %arg1: memref<8x8xi32, #tpu.memory_space<smem>>) -> (i32, i32) {
    %c0_i32 = arith.constant 0 : i32
    %c0_i32_0 = arith.constant 0 : i32
    %c0_i32_1 = arith.constant 0 : i32
    return %c0_i32, %c0_i32_0 : i32, i32
  }
  func.func @transform_2(%arg0: i32, %arg1: memref<8x8xi32, #tpu.memory_space<smem>>) -> (i32, i32) {
    %c0_i32 = arith.constant 0 : i32
    %c0_i32_0 = arith.constant 0 : i32
    %c0_i32_1 = arith.constant 0 : i32
    return %c0_i32, %c0_i32_0 : i32, i32
  }
  func.func @transform_3(%arg0: i32, %arg1: memref<8x8xi32, #tpu.memory_space<smem>>) -> (i32, i32) {
    %c0_i32 = arith.constant 0 : i32
    %c0_i32_0 = arith.constant 0 : i32
    return %arg0, %c0_i32 : i32, i32
  }
}

</mosaic_0001>

<bundles_post_ra>
// kernel: tpu_custom_call.1
= control target key start
LH: loop header
LB: loop body
LE: loop exit
PB: predicated region body
PF: predicated region fallthrough
CT: control target
= control target key end

     0   :  { %s366_s0 = inlined_call_operand.vmem [shape: s32[8,8], index: 0, kind: input, shape index: {}]   ;;  %s367_s1 = inlined_call_operand.vmem [shape: f32[104,32], index: 1, kind: input, shape index: {}]   ;;  %s368_s2 = inlined_call_operand.vmem [shape: f32[32,128], index: 2, kind: input, shape index: {}]   ;;  %s369_s3 = inlined_call_operand.vmem [shape: f32[1,128], index: 3, kind: input, shape index: {}]   ;;  %s370_s4 = inlined_call_operand.hbm [shape: f32[8,128], index: 4, kind: output, shape index: {}]  }
   0x1   :  { %s9_s17 = sshll.u32 %s366_s0, 4  ;;  %s10_s17 = int_to_ptr.vmem [resolvable:$true] %s9_s17 }
   0x2   :  { %s226_s18 = scalar_lea.vmem %s10_s17, 128  ;;  %p231_p1 = scmp.lt.s32.totalorder %s10_s17, %s10_s17 }
   0x3   :  { %p227_p0 = scmp.ne.s32.totalorder %s10_s17, %s226_s18  ;;  %p232_p2 = scmp.lt.s32.totalorder %s226_s18, %s226_s18 }
   0x5   :  { %p233_p3 = por %p232_p2, %p231_p1 }
   0x7   :  { %p234_p4 = pnand %p233_p3, %p227_p0 }
   0x9   :  { %237 = shalt.err (!%p234_p4)  }
   0xa   :  { %s272_s19 = smov [#allocation4]  }
   0xb   :  { %12 = dma.vmem_to_smem %s10_s17, 128, %s272_s19, [#allocation3] }
   0xc   :  { %264 = dma.done.wait [#allocation3], 128 }
   0xd   :  { %265 = vsyncadd [#allocation3], 4294967168 }
   0xe   :  { %14 = sfence }
   0xf   :  { %15 = vsyncpa [#allocation6], 0  ;;  %s305_s20 = smov 0  }
  0x10 LB: > { %s188_s0 = sshll.u32 %s270_s20, 7  ;;  %vm71_vm0 = vcmask 253952   ;;  %s270_s20 = sphi %s305_s20, %s27_s20  }
  0x11   : > { %s31_s21 = sld [smem:[#allocation4 + %s188_s0]]  ;;  %s35_s22 = sadd.s32 1, %s188_s0 }
  0x12   : > { %s36_s23 = sld [smem:[#allocation4 + %s35_s22]]  ;;  %s40_s24 = sadd.s32 2, %s188_s0 }
  0x13   : > { %s41_s25 = sld [smem:[#allocation4 + %s40_s24]]  ;;  %s45_s26 = sadd.s32 3, %s188_s0 }
  0x14   : > { %s46_s27 = sld [smem:[#allocation4 + %s45_s26]]  ;;  %s50_s28 = sadd.s32 4, %s188_s0 }
  0x15   : > { %s51_s29 = sld [smem:[#allocation4 + %s50_s28]]  ;;  %s55_s30 = sadd.s32 5, %s188_s0 }
  0x16   : > { %s56_s5 = sld [smem:[#allocation4 + %s55_s30]]  ;;  %s60_s6 = sadd.s32 6, %s188_s0 }
  0x17   : > { %s32_s9 = scalar_lea.vmem %s367_s1, %s31_s21  ;;  %s61_s10 = sld [smem:[#allocation4 + %s60_s6]] }
  0x18   : > { %v33_v0 = vld [vmem:[%s32_s9] sm:$0x1]  ;;  %s37_s13 = scalar_lea.vmem %s367_s1, %s36_s23  ;;  %s65_s14 = sadd.s32 7, %s188_s0 }
  0x19   : > { %v38_v1 = vld [vmem:[%s37_s13] sm:$0x1]  ;;  %s42_s17 = scalar_lea.vmem %s367_s1, %s41_s25  ;;  %s66_s18 = sld [smem:[#allocation4 + %s65_s14]] }
  0x1a   : > { %v39_v2 = vadd.f32 %v38_v1, %v33_v0  ;;  %v43_v3 = vld [vmem:[%s42_s17] sm:$0x1]  ;;  %s47_s24 = scalar_lea.vmem %s367_s1, %s46_s27 }
  0x1b   : > { %v48_v4 = vld [vmem:[%s47_s24] sm:$0x1]  ;;  %s52_s28 = scalar_lea.vmem %s367_s1, %s51_s29  ;;  %s70_s29 = scalar_lea.vmem [#allocation2], %s270_s20 }
  0x1c   : > { %v44_v5 = vadd.f32 %v43_v3, %v39_v2  ;;  %s57_s30 = scalar_lea.vmem %s367_s1, %s56_s5  ;;  %v53_v6 = vld [vmem:[%s52_s28] sm:$0x1]  ;;  %s27_s20 = sadd.s32 1, %s270_s20  }
  0x1d   : > { %s62_s7 = scalar_lea.vmem %s367_s1, %s61_s10  ;;  %v58_v8 = vld [vmem:[%s57_s30] sm:$0x1]  ;;  %p24_p5 = scmp.ge.s32.totalorder %s27_s20, 8  }
  0x1e   : > { %v49_v7 = vadd.f32 %v48_v4, %v44_v5  ;;  %v63_v10 = vld [vmem:[%s62_s7] sm:$0x1]  ;;  %v75_v16 = vld [vmem:[%s368_s2 + $0x8] sm:$0xff] (%p24_p5)  ;;  %v76_v17 = vld [vmem:[%s368_s2 + $0x10] sm:$0xff] (%p24_p5)  ;;  %v273_v18 = vmov (%p24_p5), 0.0|0.0   ;;  %vm274_vm1 = vmmov (%p24_p5), 0  }
  0x1f   : > { %s67_s9 = scalar_lea.vmem %s367_s1, %s66_s18  ;;  %v74_v15 = vld [vmem:[%s368_s2] sm:$0xff] (%p24_p5)  ;;  %207 = vmatprep.subr.bf16.mxu0 (%p24_p5), %v273_v18  ;;  %v77_v20 = vld [vmem:[%s368_s2 + $0x18] sm:$0xff] (%p24_p5)  ;;  %v275_v21 = vmov (%p24_p5), 0.0   ;;  %vm85_vm2 = vcmask (%p24_p5), 261120   ;;  %s276_s17 = smov (%p24_p5), [#allocation5]  }
  0x20   : > { %v54_v9 = vadd.f32 %v53_v6, %v49_v7  ;;  %v68_v12 = vld [vmem:[%s67_s9] sm:$0x1]  ;;  %v208_v19 = vpack.c.bf16 (%p24_p5), %v75_v16, %v74_v15  ;;  %204 = vmatprep.mubr.msk.f32.mxu0 (%p24_p5), %vm274_vm1, %v275_v21  ;;  %v211_v22 = vpack.c.bf16 (%p24_p5), %v77_v20, %v76_v17  ;;  %s166_s18 = sshll.u32 (%p24_p5), %s276_s17, 4  ;;  %s167_s18 = int_to_ptr.vmem [resolvable:$true] %s166_s18 }
  0x21   :  { %v189_v24 = vld [vmem:[%s369_s3] ss:$0 sm:$0xff] (%p24_p5)  ;;  %s238_s2 = scalar_lea.vmem (%p24_p5), %s167_s18, 128  ;;  %p243_p7 = scmp.lt.s32.totalorder (%p24_p5), %s167_s18, %s167_s18 }
  0x22   : > { %v59_v11 = vadd.f32 %v58_v8, %v54_v9  ;;  %26 = sbr.rel (!%p24_p5) target bundleno = 16 (0x10), region = 48  ;;  %209 = vmatpush3.bf16.msra.mxu0 (%p24_p5), %v208_v19  ;;  %p239_p6 = scmp.ne.s32.totalorder (%p24_p5), %s167_s18, %s238_s2 }
  0x23   :  { %210 = vmatprep.subr.bf16.mxu0 (%p24_p5), %v273_v18  ;;  %p244_p8 = scmp.lt.s32.totalorder (%p24_p5), %s238_s2, %s238_s2 }
  0x24   : > { %v64_v13 = vadd.f32 %v63_v10, %v59_v11 }
  0x25   :  { %p245_p9 = por (%p24_p5), %p244_p8, %p243_p7 }
  0x26   : > { %v69_v14 = vadd.f32 %v68_v12, %v64_v13  ;;  %212 = vmatpush3.bf16.msra.mxu0 (%p24_p5), %v211_v22 }
  0x27   :  { %p246_p10 = pnand (%p24_p5), %p245_p9, %p239_p6 }
  0x28   : > { %72 = vst.msk [vmem:[%s70_s29] sm:$0x1] %vm71_vm0, %v69_v14 }
  0x2f   :  { %v73_v23 = vld [vmem:[#allocation2] sm:$0xff] }
  0x30   :  { %205 = vmatmul.mubr.msk.f32.vlgmr.msra.gmra.mrb[0].mxu0 %vm85_vm2, %v73_v23 }
 0x103   :  { %v155_v25 = vpop.f32.mrb[0].mxu0 }
 0x104   :  { %v156_v26 = vadd.f32 %v189_v24, %v155_v25  ;;  %v206_v27 = vpop.f32.mrb[1].mxu0 }
 0x106   :  { %159 = vst [vmem:[#allocation5] sm:$0xff] %v156_v26 }
 0x107   :  { %249 = shalt.err (!%p246_p10)
}
 0x108   :  { %s250_s24 = scalar_lea.hbm %s370_s4, 128 }
 0x109   :  { %p251_p11 = scmp.ne.s32.totalorder %s370_s4, %s250_s24  ;;  %p254_p12 = scmp.lt.u32.totalorder %s250_s24, %s370_s4 }
 0x10b   :  { %p256_p13 = pnand %p254_p12, %p251_p11 }
 0x10d   :  { %259 = shalt.err (!%p256_p13)
}
 0x10e   :  { %169 = dma.vmem_to_hbm [thread:$0]  %s167_s18, 128, %s370_s4, [#allocation6]  }
 0x10f   :  { %266 = dma.done.wait [#allocation6], 128  }
 0x110   :  { %267 = vsyncadd [#allocation6], 4294967168 }
 0x111   :  { %173 = vsyncpa [#allocation6], 1 }

</bundles_post_ra>
